<compile_context>
chip_gen: v6e
topology: v6e:2x2x1
jax: 0.10.0
libtpu: 0.0.40
codegen_flags: <defaults>
</compile_context>

<pallas_src>
import math

import jax
import jax.numpy as jnp
from jax.experimental import pallas as pl
from jax.experimental.pallas import tpu as pltpu


def _layer_scale_kernel(x_ref, gamma_ref, o_ref):
    # x_ref:     (TM, TN) tile of the (lane-folded) input
    # gamma_ref: (1, TN)  float32 scale row, broadcast across rows
    x = x_ref[...].astype(jnp.float32)
    o_ref[...] = (x * gamma_ref[...]).astype(o_ref.dtype)


def _chip_tile_budget():
    """Per-chip (tile_byte_budget, vmem_limit_bytes), chosen at trace time."""
    try:
        info = pltpu.get_tpu_info()
        vmem_bytes = int(getattr(info, "vmem_capacity_bytes", 0) or 0)
    except Exception:  # info unavailable -> conservative defaults that fit all chips
        vmem_bytes = 0
    if 0 < vmem_bytes <= (64 << 20):
        # v7x-class: 64 MiB physical per-TC VMEM, ~3.2 TB/s HBM -> big tiles.
        # 4x 8 MiB in flight = 32 MiB; 48 MiB limit leaves headroom under 64 MiB.
        return 8 << 20, 48 << 20
    # v5e / v6e (128 MiB physical VMEM) or unknown: 4 MiB tiles.
    # 48 MiB scoped limit clears v5e's 16 MiB / v6e's 32 MiB scoped defaults.
    return 4 << 20, 48 << 20


def _round_up(n, mult):
    return ((n + mult - 1) // mult) * mult


def _pallas_scale(x2d, gamma_row, byte_budget, vmem_limit):
    """Runs the Pallas kernel on a 2-D (rows, d_f) view.

    Caller guarantees d_f (the lane axis) is a multiple of 128 or equals the
    full (small) feature width, so stores are lane-dense unmasked `vst`.
    """
    m_f, d_f = x2d.shape
    itemsize = x2d.dtype.itemsize
    # Native sublane tiles: (8,128) f32, (16,128) bf16/f16, (32,128) int8/fp8.
    row_align = 32 if itemsize == 1 else (16 if itemsize == 2 else 8)

    # --- Row tile from the per-chip byte budget ------------------------------
    budget_rows = max(1, byte_budget // max(1, d_f * itemsize))
    tm = min(m_f, max(row_align, (budget_rows // row_align) * row_align))

    # --- Degenerate guard: even a minimum-height stripe blows the budget -----
    tn = d_f
    if d_f * itemsize * row_align > byte_budget:
        tn = min(d_f, max(128, ((byte_budget // (row_align * itemsize)) // 128) * 128))
        tm = min(m_f, row_align)

    # --- Target >=4 (even) grid steps so both v7x TensorCores overlap --------
    grid_n = pl.cdiv(d_f, tn)
    if grid_n == 1:
        steps = pl.cdiv(m_f, tm)
        max_steps = max(1, m_f // row_align)
        target = steps
        if target < 4:
            target = min(4, max_steps)
        if target % 2 == 1 and target + 1 <= max_steps:
            target += 1
        if target != steps:
            tm = min(m_f, max(row_align, _round_up(pl.cdiv(m_f, target), row_align)))
    grid = (pl.cdiv(m_f, tm), pl.cdiv(d_f, tn))

    cost = pl.CostEstimate(
        flops=int(m_f) * int(d_f),
        transcendentals=0,
        bytes_accessed=2 * int(m_f) * int(d_f) * int(itemsize) + int(d_f) * 4,
    )

    return pl.pallas_call(
        _layer_scale_kernel,
        out_shape=jax.ShapeDtypeStruct((m_f, d_f), x2d.dtype),
        grid_spec=pltpu.PrefetchScalarGridSpec(
            num_scalar_prefetch=0,
            grid=grid,
            in_specs=[
                pl.BlockSpec((tm, tn), lambda i, j: (i, j)),
                pl.BlockSpec((1, tn), lambda i, j: (0, j)),
            ],
            out_specs=pl.BlockSpec((tm, tn), lambda i, j: (i, j)),
        ),
        compiler_params=pltpu.CompilerParams(
            dimension_semantics=("parallel", "parallel"),
            vmem_limit_bytes=int(vmem_limit),
        ),
        cost_estimate=cost,
    )(x2d, gamma_row)


def layer_scale(x: jax.Array, gamma: jax.Array, *,
                tiny_fallback_bytes: int = 256 * 1024) -> jax.Array:
    """Computes x * gamma with gamma broadcast over all but the last axis.

    Inputs smaller than `tiny_fallback_bytes` use plain XLA (launch + per-step
    pipeline overhead dominates tiny inputs; XLA fuses the multiply for free).
    Pass 0 to force the Pallas path.
    """
    orig_shape = x.shape
    d = orig_shape[-1]
    assert gamma.shape == (d,), "gamma must match the last dim of x"

    def xla_scale(v):
        return (v.astype(jnp.float32) * gamma.astype(jnp.float32)).astype(v.dtype)

    itemsize = x.dtype.itemsize
    if x.size * itemsize < tiny_fallback_bytes:
        return xla_scale(x)

    byte_budget, vmem_limit = _chip_tile_budget()

    # Flatten all leading axes into a single "rows" axis.
    x2d = x.reshape(-1, d)
    m = x2d.shape[0]

    # --- Lane-dense folding: make the lane dim a multiple of 128 -------------
    k = 1
    if d % 128 != 0:
        k = 128 // math.gcd(d, 128)  # smallest k with (k * d) % 128 == 0

    m_main = (m // k) * k
    rem = m - m_main
    if m_main == 0:
        # Fewer rows than one fold group: not worth a kernel launch.
        return xla_scale(x)

    # gamma kept in f32; tiled k times so it lines up with the folded rows.
    gamma_row = jnp.tile(gamma.astype(jnp.float32), k).reshape(1, d * k)

    main_2d = x2d[:m_main] if rem else x2d
    main_folded = main_2d.reshape(m_main // k, d * k)
    out_main = _pallas_scale(main_folded, gamma_row, byte_budget,
                             vmem_limit).reshape(m_main, d)

    if rem:
        # Tiny unfoldable tail (< k <= 128 rows) handled by XLA so the bulk
        # keeps unmasked lane-dense stores instead of masked vst.msk everywhere.
        out = jnp.concatenate([out_main, xla_scale(x2d[m_main:])], axis=0)
    else:
        out = out_main
    return out.reshape(orig_shape)


if __name__ == "__main__":
    key = jax.random.PRNGKey(0)
    init_values = 1e-05

    # Demo shape from the module: (B, S, D) transformer layout, gamma over D.
    # tiny_fallback_bytes=0 forces the Pallas path for this small demo shape.
    B, S, D = 2, 8, 32
    x = jax.random.normal(key, (B, S, D), dtype=jnp.float32)
    gamma = init_values * jnp.ones((D,), dtype=jnp.float32)
    y = jax.block_until_ready(layer_scale(x, gamma, tiny_fallback_bytes=0))
    assert y.shape == x.shape
    assert jnp.allclose(y, x * gamma, atol=1e-6, rtol=1e-6)

    # Exercises the multi-step grid + lane-folding path (default fallback).
    B2, S2, D2 = 4, 256, 160
    x2 = jax.random.normal(jax.random.PRNGKey(1), (B2, S2, D2), dtype=jnp.float32)
    gamma2 = init_values * jnp.ones((D2,), dtype=jnp.float32)
    y2 = jax.block_until_ready(layer_scale(x2, gamma2))
    assert jnp.allclose(y2, x2 * gamma2, atol=1e-6, rtol=1e-6)

    # Exercises the prefix-fold + XLA-remainder path (m % k != 0, d % 128 != 0).
    B3, S3, D3 = 3, 341, 160
    x3 = jax.random.normal(jax.random.PRNGKey(2), (B3, S3, D3), dtype=jnp.float32)
    gamma3 = init_values * jnp.ones((D3,), dtype=jnp.float32)
    y3 = jax.block_until_ready(layer_scale(x3, gamma3))
    assert jnp.allclose(y3, x3 * gamma3, atol=1e-6, rtol=1e-6)

    print("KERNEL_OK")
</pallas_src>

<mosaic_0001>
module attributes {stable_mosaic.version = 11 : i64} {
  func.func @_layer_scale_kernel(%arg0: i32, %arg1: i32, %arg2: memref<4x128xf32, #tpu.memory_space<vmem>>, %arg3: memref<1x128xf32, #tpu.memory_space<vmem>>, %arg4: memref<4x128xf32, #tpu.memory_space<vmem>>) attributes {dimension_semantics = [#tpu.dimension_semantics<parallel>, #tpu.dimension_semantics<parallel>], iteration_bounds = array<i64: 1, 1>, scalar_prefetch = 0 : i64, scratch_operands = 0 : i64, tpu.core_type = #tpu.core_type<tc>, window_params = [{transform_indices = @transform_0, window_bounds = array<i64: 4, 128>}, {transform_indices = @transform_1, window_bounds = array<i64: 1, 128>}, {transform_indices = @transform_2, window_bounds = array<i64: 4, 128>}]} {
    %c0 = arith.constant 0 : index
    %c0_0 = arith.constant 0 : index
    %0 = vector.load %arg2[%c0, %c0_0] : memref<4x128xf32, #tpu.memory_space<vmem>>, vector<4x128xf32>
    %c0_1 = arith.constant 0 : index
    %c0_2 = arith.constant 0 : index
    %1 = vector.load %arg3[%c0_1, %c0_2] : memref<1x128xf32, #tpu.memory_space<vmem>>, vector<1x128xf32>
    %2 = vector.broadcast %1 : vector<1x128xf32> to vector<4x128xf32>
    %3 = arith.mulf %0, %2 : vector<4x128xf32>
    %c0_3 = arith.constant 0 : index
    %c0_4 = arith.constant 0 : index
    %4 = vector.load %arg4[%c0_3, %c0_4] : memref<4x128xf32, #tpu.memory_space<vmem>>, vector<4x128xf32>
    tpu.vector_store %arg4[%c0_3, %c0_4], %3 {strides = array<i32>} : memref<4x128xf32, #tpu.memory_space<vmem>>, vector<4x128xf32>,
    return
  }
  func.func @transform_0(%arg0: i32, %arg1: i32) -> (i32, i32) {
    %c0_i32 = arith.constant 0 : i32
    return %arg0, %arg1 : i32, i32
  }
  func.func @transform_1(%arg0: i32, %arg1: i32) -> (i32, i32) {
    %c0_i32 = arith.constant 0 : i32
    %c0_i32_0 = arith.constant 0 : i32
    return %c0_i32, %arg1 : i32, i32
  }
  func.func @transform_2(%arg0: i32, %arg1: i32) -> (i32, i32) {
    %c0_i32 = arith.constant 0 : i32
    return %arg0, %arg1 : i32, i32
  }
}

</mosaic_0001>

<bundles_post_ra>
// kernel: tpu_custom_call.1
= control target key start
LH: loop header
LB: loop body
LE: loop exit
PB: predicated region body
PF: predicated region fallthrough
CT: control target
= control target key end

     0   :  { %7 = vsyncpa [#allocation3], 0  ;;  %s122_s0 = inlined_call_operand.hbm [shape: f32[4,128], index: 0, kind: input, shape index: {}]   ;;  %s123_s1 = inlined_call_operand.vmem [shape: f32[1,128], index: 1, kind: input, shape index: {}]   ;;  %s124_s2 = inlined_call_operand.hbm [shape: f32[4,128], index: 2, kind: output, shape index: {}]  }
   0x1   :  { %8 = vsyncpa [#allocation4], 0  ;;  %s96_s9 = smov [#allocation2]  }
   0x2   :  { %s15_s10 = sshll.u32 %s96_s9, 4  ;;  %s16_s10 = int_to_ptr.vmem [resolvable:$true] %s15_s10 }
   0x3   :  { %s60_s11 = scalar_lea.vmem %s16_s10, 64  ;;  %p65_p1 = scmp.lt.s32.totalorder %s16_s10, %s16_s10 }
   0x4   :  { %p61_p0 = scmp.ne.s32.totalorder %s16_s10, %s60_s11  ;;  %p66_p2 = scmp.lt.s32.totalorder %s60_s11, %s60_s11 }
   0x6   :  { %p67_p3 = por %p66_p2, %p65_p1 }
   0x8   :  { %p68_p4 = pnand %p67_p3, %p61_p0 }
   0xa   :  { %71 = shalt.err (!%p68_p4)
}
   0xb   :  { %18 = dma.hbm_to_vmem [thread:$0]  %s122_s0, 64, %s16_s10, [#allocation3]  }
   0xc   :  { %92 = dma.done.wait [#allocation3], 64  }
   0xd   :  { %93 = vsyncadd [#allocation3], 4294967232  ;;  %s97_s14 = smov [#allocation5]   ;;  %v24_v0 = vld [vmem:[#allocation2] sm:$0xf] }
   0xe   :  { %s40_s15 = sshll.u32 %s97_s14, 4  ;;  %v49_v1 = vld [vmem:[%s123_s1] ss:$0 sm:$0xff]  ;;  %s41_s15 = int_to_ptr.vmem [resolvable:$true] %s40_s15 }
   0xf   :  { %v32_v2 = vmul.f32 %v49_v1, %v24_v0  ;;  %s72_s18 = scalar_lea.vmem %s41_s15, 64  ;;  %p77_p6 = scmp.lt.s32.totalorder %s41_s15, %s41_s15 }
  0x10   :  { %p73_p5 = scmp.ne.s32.totalorder %s41_s15, %s72_s18  ;;  %p78_p7 = scmp.lt.s32.totalorder %s72_s18, %s72_s18 }
  0x11   :  { %33 = vst [vmem:[#allocation5] sm:$0xf] %v32_v2 }
  0x12   :  { %p79_p8 = por %p78_p7, %p77_p6 }
  0x14   :  { %p80_p9 = pnand %p79_p8, %p73_p5 }
  0x16   :  { %83 = shalt.err (!%p80_p9)
}
  0x17   :  { %43 = dma.vmem_to_hbm [thread:$0]  %s41_s15, 64, %s124_s2, [#allocation4]  }
  0x18   :  { %94 = dma.done.wait [#allocation4], 64  }
  0x19   :  { %95 = vsyncadd [#allocation4], 4294967232 }
  0x1a   :  { %47 = vsyncpa [#allocation3], 1 }
  0x1b   :  { %48 = vsyncpa [#allocation4], 1 }

</bundles_post_ra>
